<compile_context>
chip_gen: v7x
topology: tpu7x:2x2x1
jax: 0.10.0
libtpu: 0.0.40
codegen_flags: <defaults>
</compile_context>

<pallas_src>
import jax
import jax.numpy as jnp
from jax.experimental import pallas as pl
from jax.experimental.pallas import tpu as pltpu


def _linear_softmax_tpu_kernel(w_ref, b_ref, xT_ref, o_ref):
    # w_ref: SMEM (O*F,) f32   -- row-major flattened nn.Linear weight
    # b_ref: SMEM (O,)   f32
    # xT_ref: VMEM (F, TB)     -- features on sublanes, batch on lanes
    # o_ref:  VMEM (O, TB)     -- classes on sublanes, batch on lanes
    F = xT_ref.shape[0]
    O = o_ref.shape[0]

    xT = xT_ref[...].astype(jnp.float32)                     # (F, TB)

    # logits^T, one sublane row per class: pure VPU multiply-accumulate with
    # scalar weights broadcast from SMEM.  No MXU push (the padded weight tile
    # would be >97% zeros for F=4/O=3), no in-kernel transpose.
    rows = []
    for c in range(O):
        acc = b_ref[c] + w_ref[c * F] * xT[0:1, :]
        for f in range(1, F):
            acc = acc + w_ref[c * F + f] * xT[f:f + 1, :]
        rows.append(acc)                                      # each (1, TB) f32
    logits = jnp.concatenate(rows, axis=0)                    # (O, TB) f32

    # Numerically stable softmax over the class axis (sublanes).  The O-way
    # reductions are unrolled into VPU maximum/add chains -- no XLU cross-lane
    # reduce and no masked lanes.
    m = rows[0]
    for c in range(1, O):
        m = jnp.maximum(m, rows[c])                           # (1, TB)
    e = jnp.exp(logits - m)                                   # EUP exp
    denom = e[0:1, :]
    for c in range(1, O):
        denom = denom + e[c:c + 1, :]                         # (1, TB)
    # Exact IEEE divide (approx EUP reciprocal was outside the 1e-4 tolerance).
    o_ref[...] = (e / denom).astype(o_ref.dtype)


def linear_net_forward(x, w, b, *, batch_tile=8192):
    """softmax(x @ w.T + b, axis=1) via a feature-major Pallas TPU kernel.

    x: (B, F), w: (O, F), b: (O,)  ->  (B, O)
    """
    B, F = x.shape
    O, F_w = w.shape
    assert F == F_w, "weight inner dim must match input features"

    # Feature-major layout: batch on the 128-lane axis -> lane-dense x tiles,
    # unmasked output stores.  The transposes live in the XLA wrapper.
    xT = x.T                                                  # (F, B)
    w_flat = w.reshape(-1).astype(jnp.float32)                # (O*F,) -> SMEM
    b_flat = b.reshape(-1).astype(jnp.float32)                # (O,)   -> SMEM

    # Batch tile along the lane axis: multiple of 128 (or the full dim when B
    # is small), large for low per-step overhead, but capped so the grid keeps
    # >= 2 steps when possible (gives v7x's second TensorCore work).
    if B <= 128:
        TB = B
    else:
        TB = max(128, (min(batch_tile, B) // 128) * 128)
        if B >= 256 and pl.cdiv(B, TB) < 2:
            TB = max(128, ((B // 2) // 128) * 128)
    grid = (pl.cdiv(B, TB),)

    outT = pl.pallas_call(
        _linear_softmax_tpu_kernel,
        out_shape=jax.ShapeDtypeStruct((O, B), x.dtype),
        grid_spec=pltpu.PrefetchScalarGridSpec(
            num_scalar_prefetch=0,
            grid=grid,
            in_specs=[
                pl.BlockSpec(memory_space=pltpu.MemorySpace.SMEM),  # w_flat
                pl.BlockSpec(memory_space=pltpu.MemorySpace.SMEM),  # b_flat
                pl.BlockSpec((F, TB), lambda i: (0, i)),            # x^T tiles
            ],
            out_specs=pl.BlockSpec((O, TB), lambda i: (0, i)),      # out^T tiles
        ),
        compiler_params=pltpu.CompilerParams(
            # batch tiles are independent -> shard the grid across TCs on v7x
            dimension_semantics=("parallel",),
        ),
    )(w_flat, b_flat, xT)

    return outT.T                                             # (B, O)


def linear_net_apply(x, w, b, *, pallas_min_batch=512):
    """Module-level forward.  Tiny batches (literal iris sizes) stay on the
    fused XLA path where kernel-launch/grid overhead would dominate; larger
    batches use the Pallas kernel."""
    if x.shape[0] < pallas_min_batch:
        return jax.nn.softmax(x @ w.T + b, axis=1)
    return linear_net_forward(x, w, b)


if __name__ == "__main__":
    # Iris-like sizes: 4 input features, 3 classes.
    input_size, output_size = 4, 3

    key = jax.random.PRNGKey(0)
    kx, kw, kb, kx2 = jax.random.split(key, 4)

    # Deterministic parameters mimicking nn.Linear's U(-1/sqrt(in), 1/sqrt(in)).
    bound = 1.0 / (input_size ** 0.5)
    w = jax.random.uniform(kw, (output_size, input_size), jnp.float32, -bound, bound)
    b = jax.random.uniform(kb, (output_size,), jnp.float32, -bound, bound)

    # 1) Literal iris batch: single full-dim block through the Pallas kernel.
    x_small = jax.random.normal(kx, (8, input_size), jnp.float32)
    out_small = jax.block_until_ready(linear_net_forward(x_small, w, b))
    ref_small = jax.nn.softmax(x_small @ w.T + b, axis=1)
    assert out_small.shape == (8, output_size)
    assert jnp.allclose(out_small, ref_small, atol=1e-4, rtol=1e-4)

    # 2) Scaled batch: lane-dense 128-multiple tiles, 2-step parallel grid.
    x_big = jax.random.normal(kx2, (1024, input_size), jnp.float32)
    out_big = jax.block_until_ready(linear_net_forward(x_big, w, b))
    ref_big = jax.nn.softmax(x_big @ w.T + b, axis=1)
    assert out_big.shape == (1024, output_size)
    assert jnp.allclose(out_big, ref_big, atol=1e-4, rtol=1e-4)
    assert jnp.allclose(jnp.sum(out_big, axis=1), 1.0, atol=1e-4)

    print("KERNEL_OK")
</pallas_src>

<mosaic_0001>
module attributes {stable_mosaic.version = 11 : i64} {
  func.func @_linear_softmax_tpu_kernel(%arg0: i32, %arg1: memref<12xf32, #tpu.memory_space<smem>>, %arg2: memref<3xf32, #tpu.memory_space<smem>>, %arg3: memref<4x8xf32, #tpu.memory_space<vmem>>, %arg4: memref<3x8xf32, #tpu.memory_space<vmem>>) attributes {dimension_semantics = [#tpu.dimension_semantics<parallel>], iteration_bounds = array<i64: 1>, scalar_prefetch = 0 : i64, scratch_operands = 0 : i64, tpu.core_type = #tpu.core_type<tc>, window_params = [{transform_indices = @transform_0, window_bounds = array<i64: 12>}, {transform_indices = @transform_1, window_bounds = array<i64: 3>}, {transform_indices = @transform_2, window_bounds = array<i64: 4, 8>}, {transform_indices = @transform_3, window_bounds = array<i64: 3, 8>}]} {
    %c0 = arith.constant 0 : index
    %c0_0 = arith.constant 0 : index
    %0 = vector.load %arg3[%c0, %c0_0] : memref<4x8xf32, #tpu.memory_space<vmem>>, vector<4x8xf32>
    %c0_1 = arith.constant 0 : index
    %1 = memref.load %arg2[%c0_1] : memref<3xf32, #tpu.memory_space<smem>>
    %c0_2 = arith.constant 0 : index
    %2 = memref.load %arg1[%c0_2] : memref<12xf32, #tpu.memory_space<smem>>
    %3 = vector.extract_strided_slice %0 {offsets = [0, 0], sizes = [1, 8], strides = [1, 1]} : vector<4x8xf32> to vector<1x8xf32>
    %4 = vector.broadcast %2 : f32 to vector<1x8xf32>
    %5 = arith.mulf %4, %3 : vector<1x8xf32>
    %6 = vector.broadcast %1 : f32 to vector<1x8xf32>
    %7 = arith.addf %6, %5 : vector<1x8xf32>
    %c1 = arith.constant 1 : index
    %8 = memref.load %arg1[%c1] : memref<12xf32, #tpu.memory_space<smem>>
    %9 = vector.extract_strided_slice %0 {offsets = [1, 0], sizes = [1, 8], strides = [1, 1]} : vector<4x8xf32> to vector<1x8xf32>
    %10 = vector.broadcast %8 : f32 to vector<1x8xf32>
    %11 = arith.mulf %10, %9 : vector<1x8xf32>
    %12 = arith.addf %7, %11 : vector<1x8xf32>
    %c2 = arith.constant 2 : index
    %13 = memref.load %arg1[%c2] : memref<12xf32, #tpu.memory_space<smem>>
    %14 = vector.extract_strided_slice %0 {offsets = [2, 0], sizes = [1, 8], strides = [1, 1]} : vector<4x8xf32> to vector<1x8xf32>
    %15 = vector.broadcast %13 : f32 to vector<1x8xf32>
    %16 = arith.mulf %15, %14 : vector<1x8xf32>
    %17 = arith.addf %12, %16 : vector<1x8xf32>
    %c3 = arith.constant 3 : index
    %18 = memref.load %arg1[%c3] : memref<12xf32, #tpu.memory_space<smem>>
    %19 = vector.extract_strided_slice %0 {offsets = [3, 0], sizes = [1, 8], strides = [1, 1]} : vector<4x8xf32> to vector<1x8xf32>
    %20 = vector.broadcast %18 : f32 to vector<1x8xf32>
    %21 = arith.mulf %20, %19 : vector<1x8xf32>
    %22 = arith.addf %17, %21 : vector<1x8xf32>
    %c1_3 = arith.constant 1 : index
    %23 = memref.load %arg2[%c1_3] : memref<3xf32, #tpu.memory_space<smem>>
    %c4 = arith.constant 4 : index
    %24 = memref.load %arg1[%c4] : memref<12xf32, #tpu.memory_space<smem>>
    %25 = vector.extract_strided_slice %0 {offsets = [0, 0], sizes = [1, 8], strides = [1, 1]} : vector<4x8xf32> to vector<1x8xf32>
    %26 = vector.broadcast %24 : f32 to vector<1x8xf32>
    %27 = arith.mulf %26, %25 : vector<1x8xf32>
    %28 = vector.broadcast %23 : f32 to vector<1x8xf32>
    %29 = arith.addf %28, %27 : vector<1x8xf32>
    %c5 = arith.constant 5 : index
    %30 = memref.load %arg1[%c5] : memref<12xf32, #tpu.memory_space<smem>>
    %31 = vector.extract_strided_slice %0 {offsets = [1, 0], sizes = [1, 8], strides = [1, 1]} : vector<4x8xf32> to vector<1x8xf32>
    %32 = vector.broadcast %30 : f32 to vector<1x8xf32>
    %33 = arith.mulf %32, %31 : vector<1x8xf32>
    %34 = arith.addf %29, %33 : vector<1x8xf32>
    %c6 = arith.constant 6 : index
    %35 = memref.load %arg1[%c6] : memref<12xf32, #tpu.memory_space<smem>>
    %36 = vector.extract_strided_slice %0 {offsets = [2, 0], sizes = [1, 8], strides = [1, 1]} : vector<4x8xf32> to vector<1x8xf32>
    %37 = vector.broadcast %35 : f32 to vector<1x8xf32>
    %38 = arith.mulf %37, %36 : vector<1x8xf32>
    %39 = arith.addf %34, %38 : vector<1x8xf32>
    %c7 = arith.constant 7 : index
    %40 = memref.load %arg1[%c7] : memref<12xf32, #tpu.memory_space<smem>>
    %41 = vector.extract_strided_slice %0 {offsets = [3, 0], sizes = [1, 8], strides = [1, 1]} : vector<4x8xf32> to vector<1x8xf32>
    %42 = vector.broadcast %40 : f32 to vector<1x8xf32>
    %43 = arith.mulf %42, %41 : vector<1x8xf32>
    %44 = arith.addf %39, %43 : vector<1x8xf32>
    %c2_4 = arith.constant 2 : index
    %45 = memref.load %arg2[%c2_4] : memref<3xf32, #tpu.memory_space<smem>>
    %c8 = arith.constant 8 : index
    %46 = memref.load %arg1[%c8] : memref<12xf32, #tpu.memory_space<smem>>
    %47 = vector.extract_strided_slice %0 {offsets = [0, 0], sizes = [1, 8], strides = [1, 1]} : vector<4x8xf32> to vector<1x8xf32>
    %48 = vector.broadcast %46 : f32 to vector<1x8xf32>
    %49 = arith.mulf %48, %47 : vector<1x8xf32>
    %50 = vector.broadcast %45 : f32 to vector<1x8xf32>
    %51 = arith.addf %50, %49 : vector<1x8xf32>
    %c9 = arith.constant 9 : index
    %52 = memref.load %arg1[%c9] : memref<12xf32, #tpu.memory_space<smem>>
    %53 = vector.extract_strided_slice %0 {offsets = [1, 0], sizes = [1, 8], strides = [1, 1]} : vector<4x8xf32> to vector<1x8xf32>
    %54 = vector.broadcast %52 : f32 to vector<1x8xf32>
    %55 = arith.mulf %54, %53 : vector<1x8xf32>
    %56 = arith.addf %51, %55 : vector<1x8xf32>
    %c10 = arith.constant 10 : index
    %57 = memref.load %arg1[%c10] : memref<12xf32, #tpu.memory_space<smem>>
    %58 = vector.extract_strided_slice %0 {offsets = [2, 0], sizes = [1, 8], strides = [1, 1]} : vector<4x8xf32> to vector<1x8xf32>
    %59 = vector.broadcast %57 : f32 to vector<1x8xf32>
    %60 = arith.mulf %59, %58 : vector<1x8xf32>
    %61 = arith.addf %56, %60 : vector<1x8xf32>
    %c11 = arith.constant 11 : index
    %62 = memref.load %arg1[%c11] : memref<12xf32, #tpu.memory_space<smem>>
    %63 = vector.extract_strided_slice %0 {offsets = [3, 0], sizes = [1, 8], strides = [1, 1]} : vector<4x8xf32> to vector<1x8xf32>
    %64 = vector.broadcast %62 : f32 to vector<1x8xf32>
    %65 = arith.mulf %64, %63 : vector<1x8xf32>
    %66 = arith.addf %61, %65 : vector<1x8xf32>
    %67 = tpu.concatenate %22, %44, %66 in 0 : vector<1x8xf32>, vector<1x8xf32>, vector<1x8xf32> -> vector<3x8xf32>
    %68 = arith.maximumf %22, %44 : vector<1x8xf32>
    %69 = arith.maximumf %68, %66 : vector<1x8xf32>
    %70 = vector.broadcast %69 : vector<1x8xf32> to vector<3x8xf32>
    %71 = arith.subf %67, %70 : vector<3x8xf32>
    %72 = math.exp %71 : vector<3x8xf32>
    %73 = vector.extract_strided_slice %72 {offsets = [0, 0], sizes = [1, 8], strides = [1, 1]} : vector<3x8xf32> to vector<1x8xf32>
    %74 = vector.extract_strided_slice %72 {offsets = [1, 0], sizes = [1, 8], strides = [1, 1]} : vector<3x8xf32> to vector<1x8xf32>
    %75 = arith.addf %73, %74 : vector<1x8xf32>
    %76 = vector.extract_strided_slice %72 {offsets = [2, 0], sizes = [1, 8], strides = [1, 1]} : vector<3x8xf32> to vector<1x8xf32>
    %77 = arith.addf %75, %76 : vector<1x8xf32>
    %78 = vector.broadcast %77 : vector<1x8xf32> to vector<3x8xf32>
    %79 = arith.divf %72, %78 : vector<3x8xf32>
    %c0_5 = arith.constant 0 : index
    %c0_6 = arith.constant 0 : index
    %80 = vector.load %arg4[%c0_5, %c0_6] : memref<3x8xf32, #tpu.memory_space<vmem>>, vector<3x8xf32>
    tpu.vector_store %arg4[%c0_5, %c0_6], %79 {strides = array<i32>} : memref<3x8xf32, #tpu.memory_space<vmem>>, vector<3x8xf32>,
    return
  }
  func.func @transform_0(%arg0: i32) -> i32 {
    %c0_i32 = arith.constant 0 : i32
    %c0_i32_0 = arith.constant 0 : i32
    return %c0_i32 : i32
  }
  func.func @transform_1(%arg0: i32) -> i32 {
    %c0_i32 = arith.constant 0 : i32
    %c0_i32_0 = arith.constant 0 : i32
    return %c0_i32 : i32
  }
  func.func @transform_2(%arg0: i32) -> (i32, i32) {
    %c0_i32 = arith.constant 0 : i32
    %c0_i32_0 = arith.constant 0 : i32
    return %c0_i32, %arg0 : i32, i32
  }
  func.func @transform_3(%arg0: i32) -> (i32, i32) {
    %c0_i32 = arith.constant 0 : i32
    %c0_i32_0 = arith.constant 0 : i32
    return %c0_i32, %arg0 : i32, i32
  }
}

</mosaic_0001>

<bundles_post_ra>
// kernel: tpu_custom_call.1
= control target key start
LH: loop header
LB: loop body
LE: loop exit
PB: predicated region body
PF: predicated region fallthrough
CT: control target
= control target key end

     0   :  { %8 = vsyncpa [#allocation4], 0  ;;  %s317_s0 = inlined_call_operand.hbm [shape: f32[12], index: 0, kind: input, shape index: {}]   ;;  %s318_s1 = inlined_call_operand.vmem [shape: f32[3], index: 1, kind: input, shape index: {}]   ;;  %s319_s2 = inlined_call_operand.vmem [shape: f32[4,8], index: 2, kind: input, shape index: {}]   ;;  %s320_s3 = inlined_call_operand.hbm [shape: f32[3,8], index: 3, kind: output, shape index: {}]  }
   0x1   :  { %9 = vsyncpa [#allocation5], 0 }
   0x2   :  { %10 = vsyncpa [#allocation3], 0  ;;  %s25_s14 = sshll.u32 %s318_s1, 4  ;;  %s190_s17 = scalar_lea.hbm %s317_s0, 16  ;;  %s26_s14 = int_to_ptr.vmem [resolvable:$true] %s25_s14 }
   0x3   :  { %p191_p0 = scmp.ne.s32.totalorder %s317_s0, %s190_s17  ;;  %p194_p1 = scmp.lt.u32.totalorder %s190_s17, %s317_s0 }
   0x5   :  { %p196_p2 = pnand %p194_p1, %p191_p0 }
   0x7   :  { %199 = shalt.err (!%p196_p2)
}
   0x8   :  { %s240_s22 = smov [#allocation2]   ;;  %s200_s1 = scalar_lea.vmem %s26_s14, 16 }
   0x9   :  { %18 = dma.hbm_to_smem %s317_s0, 16, %s240_s22, [#allocation4]  }
   0xa   :  { %p201_p3 = scmp.ne.s32.totalorder %s26_s14, %s200_s1  ;;  %p205_p4 = scmp.lt.s32.totalorder %s26_s14, %s26_s14 }
   0xb   :  { %p206_p5 = scmp.lt.s32.totalorder %s200_s1, %s200_s1 }
   0xd   :  { %p207_p6 = por %p206_p5, %p205_p4 }
   0xf   :  { %p208_p7 = pnand %p207_p6, %p201_p3 }
  0x11   :  { %211 = shalt.err (!%p208_p7)
}
  0x12   :  { %s241_s25 = smov [#allocation6]  }
  0x13   :  { %28 = dma.vmem_to_smem %s26_s14, 16, %s241_s25, [#allocation5]  }
  0x14   :  { %234 = dma.done.wait [#allocation4], 16  }
  0x15   :  { %235 = vsyncadd [#allocation4], 4294967280 }
  0x16   :  { %236 = dma.done.wait [#allocation5], 16  }
  0x17   :  { %237 = vsyncadd [#allocation5], 4294967280 }
  0x18   :  { %37 = sfence }
  0x19   :  { %s39_s26 = sld [smem:[#allocation6]]  ;;  %s170_s28 = sld [smem:[#allocation2 + $0x1]]  ;;  %v38_v0 = vld [vmem:[%s319_s2] sm:$0xf]  ;;  %v132_v6 = vlaneseq  ;;  %vm126_vm0 = vcmask 1040384   ;;  %vm128_vm1 = vcmask 1041408  }
  0x1a   :  { %s40_s27 = sld [smem:[#allocation2]]  ;;  %s171_s29 = sld [smem:[#allocation2 + $0x2]]  ;;  %vm152_vm2 = vcmask 59392  }
  0x1b   :  { %s172_s0 = sld [smem:[#allocation2 + $0x3]]  ;;  %s278_s30 = sld [smem:[#allocation6 + $0x1]]  ;;  %v133_v47 = vshrl.u32 %v132_v6, 7 }
  0x1c   :  { %s174_s4 = sld [smem:[#allocation2 + $0x4]]  ;;  %s175_s5 = sld [smem:[#allocation2 + $0x5]] }
  0x1d   :  { %s283_s8 = sld [smem:[#allocation2 + $0x6]]  ;;  %s285_s9 = sld [smem:[#allocation2 + $0x7]]  ;;  %v134_v53 = vsub.s32 0, %v133_v47 }
  0x1e   :  { %s287_s10 = sld [smem:[#allocation6 + $0x2]]  ;;  %s289_s11 = sld [smem:[#allocation2 + $0x8]] }
  0x1f   :  { %v43_v2 = vstv %s39_s26  ;;  %s291_s12 = sld [smem:[#allocation2 + $0x9]]  ;;  %v46_v4 = vstv %s170_s28  ;;  %s293_s13 = sld [smem:[#allocation2 + $0xa]] }
  0x20   :  { %v41_v1 = vstv %s40_s27  ;;  %v53_v5 = vstv %s171_s29  ;;  %s295_s2 = sld [smem:[#allocation2 + $0xb]]  ;;  %v47_v7 = vmul.f32 %v46_v4, %v38_v0  ;;  %s242_s14 = smov [#allocation7]  }
  0x21   :  { %v42_v3 = vmul.f32 %v41_v1, %v38_v0  ;;  %v54_v8 = vmul.f32 %v53_v5, %v38_v0  ;;  %v60_v9 = vstv %s172_s0  ;;  %v70_v10 = vstv %s278_s30  ;;  %s160_s15 = sshll.u32 %s242_s14, 4  ;;  %s161_s15 = int_to_ptr.vmem [resolvable:$true] %s160_s15 }
  0x22   :  { %v61_v12 = vmul.f32 %v60_v9, %v38_v0  ;;  %v68_v13 = vstv %s174_s4  ;;  %v73_v14 = vstv %s175_s5  ;;  %v49_v15 = vrot.slane %v47_v7, 1  ;;  %s212_s16 = scalar_lea.vmem %s161_s15, 64  ;;  %p217_p9 = scmp.lt.s32.totalorder %s161_s15, %s161_s15 }
  0x23   :  { %v44_v11 = vadd.f32 %v43_v2, %v42_v3  ;;  %v56_v16 = vrot.slane %v54_v8, 2  ;;  %v69_v17 = vmul.f32 %v68_v13, %v38_v0  ;;  %v74_v18 = vmul.f32 %v73_v14, %v38_v0  ;;  %p213_p8 = scmp.ne.s32.totalorder %s161_s15, %s212_s16  ;;  %p218_p10 = scmp.lt.s32.totalorder %s212_s16, %s212_s16 }
  0x24   :  { %v63_v19 = vrot.slane %v61_v12, 3  ;;  %v80_v20 = vstv %s283_s8  ;;  %v87_v21 = vstv %s285_s9  ;;  %v95_v22 = vstv %s289_s11 }
  0x25   :  { %v51_v23 = vadd.f32 %v49_v15, %v44_v11  ;;  %v71_v24 = vadd.f32 %v70_v10, %v69_v17  ;;  %v76_v25 = vrot.slane %v74_v18, 1  ;;  %v81_v26 = vmul.f32 %v80_v20, %v38_v0  ;;  %p219_p11 = por %p218_p10, %p217_p9 }
  0x26   :  { %v88_v27 = vmul.f32 %v87_v21, %v38_v0  ;;  %v96_v28 = vmul.f32 %v95_v22, %v38_v0  ;;  %v97_v29 = vstv %s287_s10  ;;  %v100_v30 = vstv %s291_s12 }
  0x27   :  { %v58_v31 = vadd.f32 %v56_v16, %v51_v23  ;;  %v78_v32 = vadd.f32 %v76_v25, %v71_v24  ;;  %v83_v33 = vrot.slane %v81_v26, 2  ;;  %v101_v34 = vmul.f32 %v100_v30, %v38_v0  ;;  %p220_p12 = pnand %p219_p11, %p213_p8 }
  0x28   :  { %v90_v35 = vrot.slane %v88_v27, 3  ;;  %v98_v36 = vadd.f32 %v97_v29, %v96_v28  ;;  %v107_v37 = vstv %s293_s13  ;;  %v114_v38 = vstv %s295_s2 }
  0x29   :  { %v65_v39 = vadd.f32 %v63_v19, %v58_v31  ;;  %v85_v40 = vadd.f32 %v83_v33, %v78_v32  ;;  %v103_v41 = vrot.slane %v101_v34, 1  ;;  %v108_v42 = vmul.f32 %v107_v37, %v38_v0 }
  0x2a   :  { %v115_v43 = vmul.f32 %v114_v38, %v38_v0 }
  0x2b   :  { %v92_v44 = vadd.f32 %v90_v35, %v85_v40  ;;  %v105_v45 = vadd.f32 %v103_v41, %v98_v36  ;;  %v110_v46 = vrot.slane %v108_v42, 2 }
  0x2c   :  { %v117_v48 = vrot.slane %v115_v43, 3 }
  0x2d   :  { %v112_v49 = vadd.f32 %v110_v46, %v105_v45  ;;  %v121_v50 = vrot.slane %v92_v44, 7  ;;  %v130_v51 = vmax.f32 %v65_v39, %v92_v44 }
  0x2f   :  { %v119_v52 = vadd.f32 %v117_v48, %v112_v49  ;;  %v127_v54 = vsel %vm126_vm0, %v65_v39, %v121_v50 }
  0x31   :  { %v124_v55 = vrot.slane %v119_v52, 6  ;;  %v131_v56 = vmax.f32 %v130_v51, %v119_v52 }
  0x33   :  { %v129_v57 = vsel %vm128_vm1, %v127_v54, %v124_v55  ;;  %v135_v58 = vrot.slane %v131_v56, %v134_v53 }
  0x35   :  { %v136_v59 = vsub.f32 %v129_v57, %v135_v58 }
  0x37   :  { %v137_v60 = vmul.f32 1.442695, %v136_v59 }
  0x39   :  { %186 = vpow2.f32 %v137_v60 }
  0x43   :  { %v187_v61 = vpop.eup %186 }
  0x44   :  { %v140_v62 = vrot.slane %v187_v61, 1  ;;  %v143_v63 = vrot.slane %v187_v61, 2 }
  0x46   :  { %v142_v0 = vadd.f32 %v187_v61, %v140_v62 }
  0x48   :  { %v145_v1 = vadd.f32 %v143_v63, %v142_v0 }
  0x4a   :  { %v149_v2 = vrot.slane %v145_v1, %v134_v53 }
  0x4c   :  { %188 = vrcp.f32 %v149_v2 }
  0x56   :  { %v189_v3 = vpop.eup %188 }
  0x57   :  { %v151_v4 = vmul.f32 %v189_v3, %v187_v61 }
  0x59   :  { %153 = vst.msk [vmem:[#allocation7] sm:$0x7] %vm152_vm2, %v151_v4 }
  0x5a   :  { %223 = shalt.err (!%p220_p12)
}
  0x5b   :  { %s224_s19 = scalar_lea.hbm %s320_s3, 64 }
  0x5c   :  { %p225_p13 = scmp.ne.s32.totalorder %s320_s3, %s224_s19  ;;  %p228_p0 = scmp.lt.u32.totalorder %s224_s19, %s320_s3 }
  0x5e   :  { %p230_p1 = pnand %p228_p0, %p225_p13 }
  0x60   :  { %233 = shalt.err (!%p230_p1)
}
  0x61   :  { %163 = dma.vmem_to_hbm [thread:$0]  %s161_s15, 64, %s320_s3, [#allocation3]  }
  0x62   :  { %238 = dma.done.wait [#allocation3], 64  }
  0x63   :  { %239 = vsyncadd [#allocation3], 4294967232 }
  0x64   :  { %167 = vsyncpa [#allocation3], 1 }
  0x65   :  { %168 = vsyncpa [#allocation4], 1 }
  0x66   :  { %169 = vsyncpa [#allocation5], 1 }

</bundles_post_ra>
